<compile_context>
chip_gen: v6e
topology: v6e:2x2x1
jax: 0.10.0
libtpu: 0.0.40
codegen_flags: <defaults>
</compile_context>

<pallas_src>
import math

import jax
import jax.numpy as jnp
from jax.experimental import pallas as pl
from jax.experimental.pallas import tpu as pltpu

_LANES = 128
_SUBLANES = 8
_DEFAULT_TILE_ROWS = 4096          # 2 MiB per f32 streamed buffer
_VMEM_LIMIT = 32 * 1024 * 1024     # fits the pipelined buffers on all 3 chips


def _round_up(a, b):
    return ((a + b - 1) // b) * b


def _lcm(a, b):
    return a * b // math.gcd(a, b)


def _default_num_cores():
    # A leading "parallel" grid axis only helps on chips with two TensorCores
    # sharing HBM (v7x); on single-TC v5e/v6e it just shrinks the tile.
    try:
        kind = jax.devices()[0].device_kind.lower()
    except Exception:
        return 1
    return 2 if "v7" in kind else 1


def _nan_to_num(x):
    """torch.nan_to_num defaults: nan->0, +inf->dtype max, -inf->dtype min."""
    fin = jnp.finfo(x.dtype)
    x = jnp.where(jnp.isnan(x), jnp.zeros_like(x), x)
    return jnp.clip(x, jnp.array(fin.min, dtype=x.dtype),
                    jnp.array(fin.max, dtype=x.dtype))


def _pinball(x, t, q):
    diff = t - x
    return jnp.maximum(q * diff, (q - jnp.float32(1.0)) * diff)


def _fold_accumulate(loss, out_ref):
    # (tile_rows, 128) -> (8, 128) vreg-shaped partial with pure VPU adds.
    partial = loss.reshape(-1, _SUBLANES, _LANES).sum(axis=0)
    out_ref[...] += partial.reshape(1, _SUBLANES, _LANES)


def _quantile_kernel_grouped(x_ref, t_ref, q_ref, e_ref, out_ref):
    """128 % Q == 0 path.

    x_ref: (tile_rows, 128)     flat row-major [N, Q] predictions
    t_ref: (tile_rows, 128//Q)  compact per-row targets (1/Q of the bytes)
    q_ref: (1, 128)             resident quantile lane pattern
    e_ref: (128//Q, 128)        resident 0/1 expansion matrix (MXU)
    """
    @pl.when(pl.program_id(1) == 0)
    def _():
        out_ref[...] = jnp.zeros_like(out_ref)

    x = _nan_to_num(x_ref[...]).astype(jnp.float32)
    # Expand each compact target to its Q consecutive lanes with a selection
    # matmul on the otherwise-idle MXU (the kernel is HBM-bound).
    t = jnp.dot(t_ref[...].astype(jnp.float32), e_ref[...],
                preferred_element_type=jnp.float32)
    loss = _pinball(x, t, q_ref[...])
    _fold_accumulate(loss, out_ref)


def _quantile_kernel_flat(x_ref, t_ref, q_ref, out_ref):
    """General-Q fallback: x and pre-expanded targets streamed, q resident."""
    @pl.when(pl.program_id(1) == 0)
    def _():
        out_ref[...] = jnp.zeros_like(out_ref)

    x = _nan_to_num(x_ref[...]).astype(jnp.float32)
    loss = _pinball(x, t_ref[...].astype(jnp.float32), q_ref[...])
    _fold_accumulate(loss, out_ref)


def _compiler_params():
    return pltpu.CompilerParams(
        dimension_semantics=("parallel", "arbitrary"),
        vmem_limit_bytes=_VMEM_LIMIT)


def _grouped_path(input_nq, target_n, q32, tile_rows_opt, num_cores):
    """Fast path for 128 % Q == 0 (e.g. Q = 1, 2, 4, 8, 16, ...)."""
    N, Q = input_nq.shape
    G = _LANES // Q                       # atoms per 128-lane row
    rows = pl.cdiv(N, G)

    desired = _DEFAULT_TILE_ROWS if tile_rows_opt is None else tile_rows_opt
    desired = max(_SUBLANES, _round_up(desired, _SUBLANES))

    zero_copy = (N % G == 0)
    use_split = zero_copy and rows >= _SUBLANES

    if use_split:
        # Pure bitcast views: no wrapper copy of the big arrays at all.  The
        # grid covers only whole tiles; the remainder is summed in plain JAX,
        # so no block ever reads out-of-bounds (no masking required).
        tile_rows = min(desired, (rows // _SUBLANES) * _SUBLANES)
        full_blocks = rows // tile_rows
        num_cores_eff = max(1, min(num_cores, full_blocks))
        steps = full_blocks // num_cores_eff
        rows_kernel = num_cores_eff * steps * tile_rows
        x2d = input_nq.reshape(rows, _LANES)
        t2d = target_n.reshape(rows, G)
    else:
        # Small or ragged-N input: one zero-pad pass (padded x == t == 0, so
        # the padding contributes exactly zero loss).
        # TODO(synk): ragged N (N % (128/Q) != 0) cannot be viewed lane-dense
        # without this single O(numel) pad pass.
        tile_rows = min(desired, _round_up(pl.cdiv(rows, num_cores), _SUBLANES))
        num_cores_eff = num_cores
        steps = pl.cdiv(rows, num_cores_eff * tile_rows)
        rows_kernel = num_cores_eff * steps * tile_rows
        pad_atoms = rows_kernel * G - N
        x2d = jnp.pad(input_nq.reshape(-1),
                      (0, pad_atoms * Q)).reshape(rows_kernel, _LANES)
        t2d = jnp.pad(target_n.reshape(-1),
                      (0, pad_atoms)).reshape(rows_kernel, G)

    # Resident quantile lane pattern and 0/1 target-expansion matrix (tiny).
    q_tile = jnp.tile(q32, G).reshape(1, _LANES)
    e_mat = (jnp.arange(_LANES)[None, :] // Q
             == jnp.arange(G)[:, None]).astype(jnp.float32)

    row_block = lambda p, i, s=steps: (p * s + i, 0)
    partials = pl.pallas_call(
        _quantile_kernel_grouped,
        out_shape=jax.ShapeDtypeStruct(
            (num_cores_eff, _SUBLANES, _LANES), jnp.float32),
        grid_spec=pltpu.PrefetchScalarGridSpec(
            num_scalar_prefetch=0,
            grid=(num_cores_eff, steps),
            in_specs=[
                pl.BlockSpec((tile_rows, _LANES), row_block),
                pl.BlockSpec((tile_rows, G), row_block),
                pl.BlockSpec((1, _LANES), lambda p, i: (0, 0)),
                pl.BlockSpec((G, _LANES), lambda p, i: (0, 0)),
            ],
            out_specs=pl.BlockSpec((1, _SUBLANES, _LANES),
                                   lambda p, i: (p, 0, 0)),
        ),
        compiler_params=_compiler_params(),
    )(x2d, t2d, q_tile, e_mat)
    total = jnp.sum(partials)

    # Ragged remainder (only on the zero-copy path; always a small slice).
    n_tail = rows_kernel * G
    if use_split and n_tail < N:
        x_tail = _nan_to_num(input_nq[n_tail:]).astype(jnp.float32)
        t_tail = target_n[n_tail:].astype(jnp.float32).reshape(-1, 1)
        total = total + jnp.sum(_pinball(x_tail, t_tail, q32.reshape(1, Q)))
    return total


def _flat_path(input_nq, target_n, q32, tile_rows_opt, num_cores):
    """General-Q fallback (128 % Q != 0, e.g. Q = 5): stream x and the
    wrapper-expanded target; quantile levels stay resident because their lane
    pattern repeats every Q/gcd(Q,128) rows (tile_rows is a multiple of it)."""
    N, Q = input_nq.shape
    numel = N * Q
    rows = pl.cdiv(numel, _LANES)
    period = Q // math.gcd(Q, _LANES)
    base = _lcm(_SUBLANES, period)

    desired = _DEFAULT_TILE_ROWS if tile_rows_opt is None else tile_rows_opt
    tile_rows = min(_round_up(max(desired, base), base),
                    _round_up(pl.cdiv(rows, num_cores), base))
    steps = pl.cdiv(rows, num_cores * tile_rows)
    rows_kernel = num_cores * steps * tile_rows
    pad = rows_kernel * _LANES - numel

    # TODO(synk): this fallback still materializes an expanded, zero-padded
    # target stream (one extra O(numel) wrapper pass); the compact in-kernel
    # target expansion is only implemented for the common 128 % Q == 0 case.
    x2d = jnp.pad(input_nq.reshape(-1), (0, pad)).reshape(rows_kernel, _LANES)
    t2d = jnp.pad(
        jnp.broadcast_to(target_n.reshape(N, 1), (N, Q)).reshape(-1),
        (0, pad)).reshape(rows_kernel, _LANES)
    q_res = jnp.tile(q32, (tile_rows * _LANES) // Q).reshape(tile_rows, _LANES)

    row_block = lambda p, i, s=steps: (p * s + i, 0)
    partials = pl.pallas_call(
        _quantile_kernel_flat,
        out_shape=jax.ShapeDtypeStruct(
            (num_cores, _SUBLANES, _LANES), jnp.float32),
        grid_spec=pltpu.PrefetchScalarGridSpec(
            num_scalar_prefetch=0,
            grid=(num_cores, steps),
            in_specs=[
                pl.BlockSpec((tile_rows, _LANES), row_block),
                pl.BlockSpec((tile_rows, _LANES), row_block),
                pl.BlockSpec((tile_rows, _LANES), lambda p, i: (0, 0)),
            ],
            out_specs=pl.BlockSpec((1, _SUBLANES, _LANES),
                                   lambda p, i: (p, 0, 0)),
        ),
        compiler_params=_compiler_params(),
    )(x2d, t2d, q_res)
    return jnp.sum(partials)


def ddp_quantile_loss(input_nq, target_n, natoms, quantiles,
                      reduction="mean", *, tile_rows=None, num_cores=None):
    """Pallas forward of DDPQuantileLoss (world_size == 1).

    input_nq : [N, Q] predictions (one column per quantile level)
    target_n : [N]    targets
    natoms   : [B]    unused by the quantile loss (kept for signature parity)
    quantiles: [Q]    quantile levels in (0, 1)
    """
    del natoms  # the quantile loss does not use natoms
    assert reduction in ("mean", "sum")
    N, Q = input_nq.shape
    if num_cores is None:
        num_cores = _default_num_cores()
    q32 = quantiles.astype(jnp.float32).reshape(Q)

    if _LANES % Q == 0:
        total = _grouped_path(input_nq, target_n, q32, tile_rows, num_cores)
    else:
        total = _flat_path(input_nq, target_n, q32, tile_rows, num_cores)

    scale = (1.0 / (N * Q)) if reduction == "mean" else 1.0
    return total * jnp.float32(scale)


def _reference(input_nq, target_n, quantiles, reduction="mean"):
    x = jnp.nan_to_num(input_nq.astype(jnp.float32), nan=0.0)
    diff = target_n.astype(jnp.float32).reshape(-1, 1) - x
    q = quantiles.astype(jnp.float32).reshape(1, -1)
    loss = jnp.maximum(q * diff, (q - 1.0) * diff)
    s = jnp.sum(loss)
    return s / loss.size if reduction == "mean" else s


if __name__ == "__main__":
    key = jax.random.PRNGKey(0)
    k = jax.random.split(key, 8)
    natoms = jnp.array([32, 32], dtype=jnp.int32)  # unused by the quantile loss

    cases = []

    # Case 1: Q=8 (128 % Q == 0), N multiple of 128/Q -> zero-copy lane-dense
    #         path, small tile so several grid steps run; NaN/Inf injected.
    N1, Q1 = 256, 8
    qt8 = jnp.linspace(0.1, 0.9, Q1, dtype=jnp.float32)
    x1 = jax.random.normal(k[0], (N1, Q1), dtype=jnp.float32)
    x1 = x1.at[3, 2].set(jnp.nan).at[100, 5].set(jnp.inf)
    t1 = jax.random.normal(k[1], (N1,), dtype=jnp.float32)
    cases.append((x1, t1, qt8, dict(tile_rows=8)))

    # Case 2: zero-copy path with a ragged block remainder summed in plain JAX.
    N2 = 272
    x2 = jax.random.normal(k[2], (N2, Q1), dtype=jnp.float32)
    t2 = jax.random.normal(k[3], (N2,), dtype=jnp.float32)
    cases.append((x2, t2, qt8, dict(tile_rows=8)))

    # Case 3: Q=8 but N not a multiple of 128/Q -> single padded-copy branch.
    N3 = 250
    x3 = jax.random.normal(k[4], (N3, Q1), dtype=jnp.float32)
    t3 = jax.random.normal(k[5], (N3,), dtype=jnp.float32)
    cases.append((x3, t3, qt8, {}))

    # Case 4: general Q (128 % Q != 0) fallback path with resident quantiles.
    N4, Q4 = 50, 5
    qt5 = jnp.linspace(0.05, 0.95, Q4, dtype=jnp.float32)
    x4 = jax.random.normal(k[6], (N4, Q4), dtype=jnp.float32)
    t4 = jax.random.normal(k[7], (N4,), dtype=jnp.float32)
    cases.append((x4, t4, qt5, {}))

    for (x, t, qt, kwargs) in cases:
        for red in ("mean", "sum"):
            got = ddp_quantile_loss(x, t, natoms, qt, reduction=red, **kwargs)
            got = jax.block_until_ready(got)
            want = _reference(x, t, qt, reduction=red)
            assert jnp.allclose(got, want, rtol=1e-5, atol=1e-5), (red, got, want)

    print("KERNEL_OK")
</pallas_src>

<mosaic_0001>
module attributes {stable_mosaic.version = 11 : i64} {
  func.func @_quantile_kernel_grouped(%arg0: i32, %arg1: i32, %arg2: memref<8x128xf32, #tpu.memory_space<vmem>>, %arg3: memref<8x16xf32, #tpu.memory_space<vmem>>, %arg4: memref<1x128xf32, #tpu.memory_space<vmem>>, %arg5: memref<16x128xf32, #tpu.memory_space<vmem>>, %arg6: memref<1x8x128xf32, #tpu.memory_space<vmem>>) attributes {dimension_semantics = [#tpu.dimension_semantics<parallel>, #tpu.dimension_semantics<arbitrary>], iteration_bounds = array<i64: 1, 2>, scalar_prefetch = 0 : i64, scratch_operands = 0 : i64, tpu.core_type = #tpu.core_type<tc>, window_params = [{transform_indices = @transform_0, window_bounds = array<i64: 8, 128>}, {transform_indices = @transform_1, window_bounds = array<i64: 8, 16>}, {pipeline_mode = #tpu.pipeline_mode<synchronous>, transform_indices = @transform_2, window_bounds = array<i64: 1, 128>}, {pipeline_mode = #tpu.pipeline_mode<synchronous>, transform_indices = @transform_3, window_bounds = array<i64: 16, 128>}, {transform_indices = @transform_4, window_bounds = array<i64: 1, 8, 128>}]} {
    %c0_i32 = arith.constant 0 : i32
    %0 = arith.cmpi eq, %arg1, %c0_i32 : i32
    %1 = arith.extui %0 : i1 to i32
    %c0_i32_0 = arith.constant 0 : i32
    %2 = arith.cmpi ne, %1, %c0_i32_0 : i32
    scf.if %2 {
      %cst_19 = arith.constant 0.000000e+00 : f32
      %29 = vector.broadcast %cst_19 : f32 to vector<1x8x128xf32>
      %c0_20 = arith.constant 0 : index
      %c0_21 = arith.constant 0 : index
      %c0_22 = arith.constant 0 : index
      %30 = vector.load %arg6[%c0_20, %c0_21, %c0_22] : memref<1x8x128xf32, #tpu.memory_space<vmem>>, vector<1x8x128xf32>
      tpu.vector_store %arg6[%c0_20, %c0_21, %c0_22], %29 {strides = array<i32>} : memref<1x8x128xf32, #tpu.memory_space<vmem>>, vector<1x8x128xf32>,
    } else {
    }
    %c0 = arith.constant 0 : index
    %c0_1 = arith.constant 0 : index
    %3 = vector.load %arg2[%c0, %c0_1] : memref<8x128xf32, #tpu.memory_space<vmem>>, vector<8x128xf32>
    %4 = arith.cmpf one, %3, %3 : vector<8x128xf32>
    %cst = arith.constant 0.000000e+00 : f32
    %5 = vector.broadcast %cst : f32 to vector<8x128xf32>
    %6 = arith.select %4, %5, %3 : vector<8x128xi1>, vector<8x128xf32>
    %cst_2 = arith.constant -3.40282347E+38 : f32
    %cst_3 = arith.constant 3.40282347E+38 : f32
    %7 = vector.broadcast %cst_2 : f32 to vector<8x128xf32>
    %8 = arith.maximumf %7, %6 : vector<8x128xf32>
    %9 = vector.broadcast %cst_3 : f32 to vector<8x128xf32>
    %10 = arith.minimumf %9, %8 : vector<8x128xf32>
    %c0_4 = arith.constant 0 : index
    %c0_5 = arith.constant 0 : index
    %11 = vector.load %arg3[%c0_4, %c0_5] : memref<8x16xf32, #tpu.memory_space<vmem>>, vector<8x16xf32>
    %c0_6 = arith.constant 0 : index
    %c0_7 = arith.constant 0 : index
    %12 = vector.load %arg5[%c0_6, %c0_7] : memref<16x128xf32, #tpu.memory_space<vmem>>, vector<16x128xf32>
    %cst_8 = arith.constant dense<0.000000e+00> : vector<8x128xf32>
    %13 = tpu.matmul %11, %12, %cst_8 {dimension_numbers = #tpu.dot_dimension_numbers<[1], [0], [0], [1], [0, 0, 1, 1], [], []>} : vector<8x16xf32>, vector<16x128xf32>, vector<8x128xf32> -> vector<8x128xf32>
    %c0_9 = arith.constant 0 : index
    %c0_10 = arith.constant 0 : index
    %14 = vector.load %arg4[%c0_9, %c0_10] : memref<1x128xf32, #tpu.memory_space<vmem>>, vector<1x128xf32>
    %15 = arith.subf %13, %10 : vector<8x128xf32>
    %16 = vector.broadcast %14 : vector<1x128xf32> to vector<8x128xf32>
    %17 = arith.mulf %16, %15 : vector<8x128xf32>
    %cst_11 = arith.constant 1.000000e+00 : f32
    %18 = vector.broadcast %cst_11 : f32 to vector<1x128xf32>
    %19 = arith.subf %14, %18 : vector<1x128xf32>
    %20 = vector.broadcast %19 : vector<1x128xf32> to vector<8x128xf32>
    %21 = arith.mulf %20, %15 : vector<8x128xf32>
    %22 = arith.maximumf %17, %21 : vector<8x128xf32>
    %23 = vector.shape_cast %22 : vector<8x128xf32> to vector<1x8x128xf32>
    %cst_12 = arith.constant dense<0.000000e+00> : vector<8x128xf32>
    %24 = vector.multi_reduction <add>, %23, %cst_12 [0] : vector<1x8x128xf32> to vector<8x128xf32>
    %c0_13 = arith.constant 0 : index
    %c0_14 = arith.constant 0 : index
    %c0_15 = arith.constant 0 : index
    %25 = vector.load %arg6[%c0_13, %c0_14, %c0_15] : memref<1x8x128xf32, #tpu.memory_space<vmem>>, vector<1x8x128xf32>
    %26 = vector.shape_cast %24 : vector<8x128xf32> to vector<1x8x128xf32>
    %27 = arith.addf %25, %26 : vector<1x8x128xf32>
    %c0_16 = arith.constant 0 : index
    %c0_17 = arith.constant 0 : index
    %c0_18 = arith.constant 0 : index
    %28 = vector.load %arg6[%c0_16, %c0_17, %c0_18] : memref<1x8x128xf32, #tpu.memory_space<vmem>>, vector<1x8x128xf32>
    tpu.vector_store %arg6[%c0_16, %c0_17, %c0_18], %27 {strides = array<i32>} : memref<1x8x128xf32, #tpu.memory_space<vmem>>, vector<1x8x128xf32>,
    return
  }
  func.func @transform_0(%arg0: i32, %arg1: i32) -> (i32, i32) {
    %c2_i32 = arith.constant 2 : i32
    %0 = arith.muli %arg0, %c2_i32 : i32
    %1 = arith.addi %0, %arg1 : i32
    %c0_i32 = arith.constant 0 : i32
    %c0_i32_0 = arith.constant 0 : i32
    return %1, %c0_i32 : i32, i32
  }
  func.func @transform_1(%arg0: i32, %arg1: i32) -> (i32, i32) {
    %c2_i32 = arith.constant 2 : i32
    %0 = arith.muli %arg0, %c2_i32 : i32
    %1 = arith.addi %0, %arg1 : i32
    %c0_i32 = arith.constant 0 : i32
    %c0_i32_0 = arith.constant 0 : i32
    return %1, %c0_i32 : i32, i32
  }
  func.func @transform_2(%arg0: i32, %arg1: i32) -> (i32, i32) {
    %c0_i32 = arith.constant 0 : i32
    %c0_i32_0 = arith.constant 0 : i32
    %c0_i32_1 = arith.constant 0 : i32
    return %c0_i32, %c0_i32_0 : i32, i32
  }
  func.func @transform_3(%arg0: i32, %arg1: i32) -> (i32, i32) {
    %c0_i32 = arith.constant 0 : i32
    %c0_i32_0 = arith.constant 0 : i32
    %c0_i32_1 = arith.constant 0 : i32
    return %c0_i32, %c0_i32_0 : i32, i32
  }
  func.func @transform_4(%arg0: i32, %arg1: i32) -> (i32, i32, i32) {
    %c0_i32 = arith.constant 0 : i32
    %c0_i32_0 = arith.constant 0 : i32
    %c0_i32_1 = arith.constant 0 : i32
    return %arg0, %c0_i32, %c0_i32_0 : i32, i32, i32
  }
}

</mosaic_0001>

<bundles_post_ra>
// kernel: tpu_custom_call.1
= control target key start
LH: loop header
LB: loop body
LE: loop exit
PB: predicated region body
PF: predicated region fallthrough
CT: control target
= control target key end

     0   :  { %9 = vsyncpa [#allocation3], 0  ;;  %s972_s0 = inlined_call_operand.hbm [shape: f32[16,128], index: 0, kind: input, shape index: {}]   ;;  %s973_s1 = inlined_call_operand.hbm [shape: f32[16,16], index: 1, kind: input, shape index: {}]   ;;  %s974_s2 = inlined_call_operand.vmem [shape: f32[1,128], index: 2, kind: input, shape index: {}]   ;;  %s975_s3 = inlined_call_operand.hbm [shape: f32[16,128], index: 3, kind: input, shape index: {}]   ;;  %s976_s4 = inlined_call_operand.hbm [shape: f32[1,8,128], index: 4, kind: output, shape index: {}]  }
   0x1   :  { %11 = vsyncpa [#allocation3 + $0x1], 0 }
   0x2   :  { %12 = vsyncpa [#allocation6], 0 }
   0x3   :  { %14 = vsyncpa [#allocation6 + $0x1], 0 }
   0x4   :  { %15 = vsyncpa [#allocation4], 0  ;;  %s817_s15 = smov 0   ;;  %s819_s16 = smov 0  }
   0x5   :  { %s821_s17 = smov 0   ;;  %s823_s18 = smov 0  }
   0x6   :  { %s825_s19 = smov 0   ;;  %s827_s20 = smov 0  }
   0x7 LB: > { %s846_s21 = sadd.s32 4294967295, %s781_s20   ;;  %p57_p0 = scmp.ne.s32.totalorder %s765_s16, %s761_s15  ;;  %s781_s20 = sphi %s827_s20, %s21_s20   ;;  %s777_s19 = sphi %s825_s19, %s985_s19   ;;  %s773_s18 = sphi %s823_s18, %s984_s18   ;;  %s769_s17 = sphi %s821_s17, %s983_s17   ;;  %s765_s16 = sphi %s819_s16, %s982_s16   ;;  %s761_s15 = sphi %s817_s15, %s981_s15  }
   0x8   : > { %p58_p1 = scmp.eq.s32.totalorder %s846_s21, 0  ;;  %p501_p2 = scmp.ge.s32.totalorder %s781_s20, 1 }
   0x9   : > { %p166_p3 = scmp.lt.s32.totalorder %s781_s20, 3  ;;  %s783_s24 = smov [#allocation7]  }
   0xa   : > { %p854_p4 = por %p58_p1, %p57_p0  ;;  %s181_s25 = sshll.u32 %s783_s24, 4  ;;  %s182_s25 = int_to_ptr.vmem [resolvable:$true] %s181_s25 }
   0xb   : > { %p858_p5 = pnand %p501_p2, %p166_p3  ;;  %s30_s27 = sadd.s32 1, %s777_s19 }
   0xc   : > { %s624_s28 = scalar_lea.vmem %s182_s25, 256  ;;  %p632_p12 = scmp.lt.s32.totalorder %s182_s25, %s182_s25 }
   0xd   : > { %p542_p6 = pneg %p858_p5  ;;  %p625_p9 = scmp.ne.s32.totalorder %s182_s25, %s624_s28 }
   0xe   : > { %p633_p13 = scmp.lt.s32.totalorder %s624_s28, %s624_s28 }
   0xf   : > { %p866_p7 = pnand %p542_p6, %p58_p1 }
  0x10   : > { %p634_p0 = por %p633_p13, %p632_p12 }
  0x11   : > { %p615_p8 = pneg %p866_p7 }
  0x13   : > { %p627_p10 = pnand %p625_p9, %p615_p8 }
  0x15   : > { %p628_p11 = pneg %p627_p10 }
  0x17   : > { %p635_p2 = pnand %p634_p0, %p628_p11 }
  0x19   : > { %638 = shalt.err (!%p635_p2)
}
  0x1a   : > { %s784_s29 = smov 128   ;;  %s785_s30 = smov 8  }
  0x1b   : > { %545 = dma.hbm_to_vmem [thread:$0]  (!%p866_p7), %s975_s3, 256, %s182_s25, [#allocation6], %s784_s29, %s784_s29, %s785_s30  }
  0x1c   : > { %p31_p3 = scmp.ge.s32.totalorder %s30_s27, 2  ;;  %s44_s7 = sadd.s32 1, %s769_s17 }
  0x1d   : > { %p51_p6 = scmp.ne.s32.totalorder %s769_s17, %s765_s16  ;;  %p52_p8 = scmp.eq.s32.totalorder %s781_s20, 0 }
  0x1e   : > { %s987_s27 = smov (%p31_p3, %s30_s27), 0  ;;  %p554_p10 = scmp.lt.s32.totalorder %s781_s20, 2 }
  0x1f   : > { %p53_p9 = por %p52_p8, %p51_p6  ;;  %s41_s8 = ssub.s32 %s777_s19, %s987_s27 }
  0x20   : > { %s195_s9 = sand.u32 1, %s769_s17   ;;  %p42_p11 = scmp.eq.s32.totalorder %s41_s8, 0 }
  0x21   : > { %s504_s10 = sshll.u32 %s195_s9, 3  ;;  %s505_s11 = sshll.u32 %s777_s19, 7 }
  0x22   : > { %s890_s12 = scalar_select %p42_p11, %s769_s17, %s44_s7  }
  0x23   : > { %s206_s15 = scalar_lea.hbm %s972_s0, %s505_s11  ;;  %s199_s24 = scalar_lea.vmem [#allocation2], %s504_s10 }
  0x24   : > { %s208_s25 = sshll.u32 %s199_s24, 4  ;;  %p895_p7 = pnand %p554_p10, %p53_p9  ;;  %s209_s25 = int_to_ptr.vmem [resolvable:$true] %s208_s25 }
  0x25   : > { %s902_s30 = scalar_lea.hbm %s973_s1, %s505_s11  ;;  %s196_s5 = scalar_lea.sflag [#allocation3], %s195_s9 }
  0x26   : > { %p641_p12 = pneg %p895_p7  ;;  %s652_s6 = scalar_lea.vmem %s209_s25, 128 }
  0x27   : > { %p653_p13 = scmp.ne.s32.totalorder %s209_s25, %s652_s6  ;;  %s786_s7 = smov [#allocation2]  }
  0x28   : > { %s657_s8 = sshll.u32 %s786_s7, 4  ;;  %s658_s8 = int_to_ptr.vmem [resolvable:$false] %s657_s8 }
  0x29   : > { %p655_p0 = pnand %p653_p13, %p641_p12  ;;  %s659_s13 = scalar_lea.vmem %s658_s8, 256 }
  0x2a   : > { %p660_p3 = scmp.lt.s32.totalorder %s209_s25, %s658_s8  ;;  %p661_p6 = scmp.lt.s32.totalorder %s659_s13, %s652_s6 }
  0x2b   : > { %p656_p2 = pneg %p655_p0 }
  0x2c   : > { %p662_p8 = por %p661_p6, %p660_p3 }
  0x2e   : > { %p663_p9 = pnand %p662_p8, %p656_p2 }
  0x30   : > { %666 = shalt.err (!%p663_p9)
}
  0x31   : > { %549 = dma.hbm_to_vmem [thread:$0]  (!%p895_p7), %s206_s15, 128, %s209_s25, %s196_s5  }
  0x32   : > { %s215_s9 = sand.u32 1, %s781_s20   ;;  %s219_s11 = scalar_lea.vmem [#allocation5], %s504_s10 }
  0x33   : > { %s228_s14 = sshll.u32 %s219_s11, 4  ;;  %s216_s24 = scalar_lea.sflag [#allocation6], %s215_s9  ;;  %s229_s14 = int_to_ptr.vmem [resolvable:$true] %s228_s14 }
  0x34   : > { %s680_s28 = scalar_lea.vmem %s229_s14, 128  ;;  %s787_s29 = smov [#allocation5]  }
  0x35   : > { %p681_p10 = scmp.ne.s32.totalorder %s229_s14, %s680_s28  ;;  %s685_s6 = sshll.u32 %s787_s29, 4  ;;  %s686_s6 = int_to_ptr.vmem [resolvable:$false] %s685_s6 }
  0x36   : > { %s687_s7 = scalar_lea.vmem %s686_s6, 256  ;;  %p688_p0 = scmp.lt.s32.totalorder %s229_s14, %s686_s6 }
  0x37   : > { %p683_p11 = pnand %p681_p10, %p641_p12  ;;  %p689_p2 = scmp.lt.s32.totalorder %s687_s7, %s680_s28 }
  0x39   : > { %p684_p13 = pneg %p683_p11  ;;  %p690_p3 = por %p689_p2, %p688_p0 }
  0x3b   : > { %p691_p6 = pnand %p690_p3, %p684_p13 }
  0x3d   : > { %694 = shalt.err (!%p691_p6)
}
  0x3e   : > { %552 = dma.hbm_to_vmem [thread:$0]  (!%p895_p7), %s902_s30, 128, %s229_s14, %s216_s24  }
  0x3f   : > { %237 = sbr.rel (%p858_p5) target bundleno = 294 (0x126), region = 36  ;;  %s239_s10 = sand.u32 (!%p858_p5), 1, %s765_s16  }
  0x40   : > { %s921_s15 = sshll.u32 (!%p858_p5), %s239_s10, 3  ;;  %s240_s25 = scalar_lea.sflag (!%p858_p5), [#allocation3], %s239_s10 }
  0x41   : > { %s243_s5 = scalar_lea.vmem (!%p858_p5), [#allocation2], %s921_s15 }
  0x44   : > { %744 = dma.done.wait (%p854_p4), %s240_s25, 128  }
  0x45   : > { %746 = vsyncadd (%p854_p4), %s240_s25, 4294967168  ;;  %s248_s26 = sand.u32 1, %s846_s21   ;;  %s252_s23 = scalar_lea.vmem [#allocation5], %s921_s15 }
  0x46   : > { %s249_s30 = scalar_lea.sflag [#allocation6], %s248_s26 }
  0x47   : > { %748 = dma.done.wait (%p854_p4), %s249_s30, 128  }
  0x48   : > { %750 = vsyncadd (%p854_p4), %s249_s30, 4294967168 }
  0x49   : > { %752 = dma.done.wait (%p58_p1), [#allocation6], 256  }
  0x4a   : > { %754 = vsyncadd (%p58_p1), [#allocation6], 4294967040  ;;  %p512_p5 = scmp.ne.s32.totalorder %s773_s18, 0 }
  0x4c   : > { %288 = sbr.rel (%p512_p5) target bundleno = 83 (0x53), region = 52 }
  0x51   : > { %v788_v0 = vmov 0.0  }
  0x52   : > { %289 = vst [vmem:[#allocation8] sm:$0xff] %v788_v0 }
  0x53 PF: > { %v297_v1 = vld [vmem:[#allocation7 + $0x8] sm:$0xff]  ;;  %v789_v2 = vmov 0.0   ;;  %v296_v3 = vld [vmem:[#allocation7] sm:$0xff]  ;;  %vm790_vm0 = vmmov 0   ;;  %v295_v4 = vld [vmem:[%s252_s23] sm:$0xff]  ;;  %vm298_vm1 = vcmask 130048   ;;  %v375_v5 = vlaneseq }
  0x54   : > { %523 = vmatprep.subr.mxu0 %v789_v2  ;;  %527 = vmatprep.mubr.msk.f32.mxu0 %vm790_vm0, %v789_v2  ;;  %v290_v6 = vld [vmem:[%s243_s5] sm:$0xff]  ;;  %s791_s8 = smov [#allocation8]   ;;  %p556_p1 = scmp.eq.s32.totalorder %s846_s21, 1 }
  0x55   : > { %524 = vmatpush3.msra.mxu0 %v297_v1  ;;  %vm291_vm2 = vcmp.ne.f32.partialorder %v290_v6, %v290_v6  ;;  %v376_v7 = vshrl.u32 %v375_v5, 7  ;;  %v372_v8 = vld [vmem:[%s974_s2] sm:$0x1]  ;;  %s403_s13 = sshll.u32 %s791_s8, 4  ;;  %s404_s13 = int_to_ptr.vmem [resolvable:$true] %s403_s13 }
  0x56   : > { %525 = vmatprep.subr.mxu0 %v789_v2  ;;  %v292_v9 = vsel %vm291_vm2, 0.0, %v290_v6  ;;  %v515_v11 = vadd.f32 -1.0, %v372_v8  ;;  %s695_s9 = scalar_lea.vmem %s404_s13, 128  ;;  %p702_p8 = scmp.lt.s32.totalorder %s404_s13, %s404_s13 }
  0x57   : > { %526 = vmatpush3.msra.mxu0 %v296_v3  ;;  %v377_v10 = vsub.s32 0, %v376_v7  ;;  %v513_v12 = vclamps-f32 %v292_v9, 3.4028235e+38  ;;  %p696_p4 = scmp.ne.s32.totalorder %s404_s13, %s695_s9  ;;  %p703_p9 = scmp.lt.s32.totalorder %s695_s9, %s695_s9 }
  0x58   : > { %528 = vmatmul.mubr.msk.f32.vlgmr.msra.gmra.mxu0 %vm298_vm1, %v295_v4 }
  0x59   : > { %v378_v13 = vrot.slane %v372_v8, %v377_v10  ;;  %v386_v14 = vrot.slane %v515_v11, %v377_v10  ;;  %v391_v20 = vld [vmem:[#allocation8] sm:$0xff]  ;;  %p697_p7 = pnand %p696_p4, %p556_p1  ;;  %p704_p10 = por %p703_p9, %p702_p8 }
  0x5b   : > { %p698_p12 = pneg %p697_p7 }
  0x5d   : > { %p705_p11 = pnand %p704_p10, %p698_p12 }
 0x118   : > { %v368_v15 = vpop.f32.mrf.mxu0 }
 0x119   : > { %v373_v16 = vsub.f32 %v368_v15, %v513_v12 }
 0x11a   : > { %v529_v17 = vpop.f32.mrf.mxu0 }
 0x11b   : > { %v380_v18 = vmul.f32 %v378_v13, %v373_v16  ;;  %v388_v19 = vmul.f32 %v386_v14, %v373_v16 }
 0x11d   : > { %v389_v21 = vmax.f32 %v380_v18, %v388_v19 }
 0x11f   : > { %v392_v22 = vadd.f32 %v391_v20, %v389_v21 }
 0x121   : > { %393 = vst [vmem:[#allocation8] sm:$0xff] %v392_v22 }
 0x122   : > { %708 = shalt.err (!%p705_p11)
}
 0x123   : > { %539 = dma.vmem_to_hbm [thread:$0]  (%p556_p1), %s404_s13, 128, %s976_s4, [#allocation4]  }
 0x124   : > { %756 = dma.done.wait (%p556_p1), [#allocation4], 128  }
 0x125   : > { %758 = vsyncadd (%p556_p1), [#allocation4], 4294967168 }
 0x126 PF: > { %s21_s20 = sadd.s32 1, %s781_s20   ;;  %s981_s15 = smov %s765_s16 }
 0x127   : > { %p18_p13 = scmp.ge.s32.totalorder %s21_s20, 4   ;;  %s982_s16 = smov %s769_s17 }
 0x128   : > { %s983_s17 = smov %s890_s12  ;;  %s984_s18 = smov %s777_s19 }
 0x129   : > { %s985_s19 = smov %s987_s27  ;;  %20 = sbr.rel (!%p18_p13) target bundleno = 7 (0x7), region = 95 }
 0x12e   :  { %416 = vsyncpa [#allocation3], 1 }
 0x12f   :  { %418 = vsyncpa [#allocation3 + $0x1], 1 }
 0x130   :  { %419 = vsyncpa [#allocation6], 1 }
 0x131   :  { %421 = vsyncpa [#allocation6 + $0x1], 1 }
 0x132   :  { %422 = vsyncpa [#allocation4], 1 }
 0x133   :  { %424 = vsyncpa [#allocation4 + $0x1], 1 }

</bundles_post_ra>
